<compile_context>
chip_gen: v7x
topology: tpu7x:2x2x1
jax: 0.10.0
libtpu: 0.0.40
codegen_flags: <defaults>
</compile_context>

<pallas_src>
import functools

import jax
import jax.numpy as jnp
from jax.experimental import pallas as pl
from jax.experimental.pallas import tpu as pltpu


_NEG_INF = -1e30  # finite "minus infinity": avoids inf-inf NaNs in the masked max/exp


def _round_up(x, m):
    return (x + m - 1) // m * m


def _supcon_neg_kernel(anchor_ref, contrast_t_ref, lab_row_ref, lab_col_ref,
                       out_ref, *, inv_temp, row_scale, n_anchor, block_rows):
    """One tile of TB anchor rows vs. the full resident contrast set.

    anchor_ref:     (TB, D)  compute dtype, streamed per grid step
    contrast_t_ref: (D, N)   compute dtype, resident
    lab_row_ref:    (TB, 1)  int32 anchor labels (per tile)
    lab_col_ref:    (1, N)   int32 contrast labels (resident)
    out_ref:        (1, 8, 128) f32 per-tile partial loss sum (lane-dense store)
    """
    i = pl.program_id(0)
    r0 = i * block_rows

    a = anchor_ref[...]
    ct = contrast_t_ref[...]

    # logits = (A @ C^T) / temperature  -> (TB, N), f32 accumulation on the MXU.
    logits = jax.lax.dot_general(
        a, ct, dimension_numbers=(((1,), (0,)), ((), ())),
        preferred_element_type=jnp.float32) * inv_temp

    tb, n = logits.shape
    row_ids = r0 + jax.lax.broadcasted_iota(jnp.int32, (tb, 1), 0)  # global anchor index
    col_ids = jax.lax.broadcasted_iota(jnp.int32, (tb, n), 1)

    pos = col_ids == row_ids                               # positive = the anchor's own column
    diff_class = lab_row_ref[...] != lab_col_ref[...]      # (TB, N) negatives (different class)
    den_mask = jnp.logical_or(diff_class, pos)             # denominator: negatives + self

    # Fused, max-shifted, masked log-sum-exp over the denominator entries.
    masked = jnp.where(den_mask, logits, _NEG_INF)
    m = jnp.max(masked, axis=1, keepdims=True)             # finite: self is always unmasked
    s = jnp.sum(jnp.exp(masked - m), axis=1, keepdims=True)
    lse = m + jnp.log(s)

    # log-prob at the (single) positive column == the diagonal logit.
    diag = jnp.sum(jnp.where(pos, logits, 0.0), axis=1, keepdims=True)

    # loss_i = -(T / base_T) * (diag - lse); padded anchor rows contribute 0.
    per_row = lse - diag
    valid = row_ids < n_anchor
    partial = jnp.sum(jnp.where(valid, per_row, 0.0)) * row_scale

    out_ref[...] = jnp.broadcast_to(partial, (1, 8, 128)).astype(jnp.float32)


def supcon_neg_loss(features, labels=None, mask=None, *,
                    temperature=1.0, contrast_mode='all', base_temperature=0.5,
                    compute_dtype=jnp.bfloat16, block_rows=512):
    """JAX/Pallas equivalent of SupConNegLoss.forward.

    features: [bsz, n_views, ...] ; labels: [bsz] int or None (SimCLR).
    Returns a scalar f32 loss.
    """
    if features.ndim < 3:
        raise ValueError('`features` needs to be [bsz, n_views, ...]')
    if mask is not None:
        # TODO(synk): arbitrary user-supplied (possibly asymmetric) `mask` is not
        # expressible as a label-equality test; only the labels / SimCLR paths are ported.
        raise NotImplementedError('explicit `mask` argument is not supported')

    bsz, n_views = features.shape[0], features.shape[1]
    feats = features.reshape(bsz, n_views, -1)
    d = feats.shape[-1]

    if labels is None:
        # eye(bsz) base mask == "every sample is its own class"
        labels = jnp.arange(bsz, dtype=jnp.int32)
    labels = labels.reshape(-1).astype(jnp.int32)
    if labels.shape[0] != bsz:
        raise ValueError('Num of labels does not match num of features')

    # contrast set: views stacked view-major == torch.cat(torch.unbind(f, 1), 0)
    contrast = jnp.transpose(feats, (1, 0, 2)).reshape(n_views * bsz, d)
    contrast_labels = jnp.tile(labels, n_views)

    if contrast_mode == 'one':
        anchor, anchor_labels = feats[:, 0], labels
    elif contrast_mode == 'all':
        anchor, anchor_labels = contrast, contrast_labels
    else:
        raise ValueError('Unknown mode: {}'.format(contrast_mode))

    n_anchor = anchor.shape[0]
    n_contrast = contrast.shape[0]

    # Tile the anchor rows (multiple of 8 sublanes); pad rows are masked in-kernel.
    tb = _round_up(min(block_rows, n_anchor), 8)
    n_pad = _round_up(n_anchor, tb)
    num_tiles = n_pad // tb
    if n_pad != n_anchor:
        anchor = jnp.pad(anchor, ((0, n_pad - n_anchor), (0, 0)))
        anchor_labels = jnp.pad(anchor_labels, (0, n_pad - n_anchor))

    anchor = anchor.astype(compute_dtype)                                # (n_pad, D)
    contrast_t = jnp.transpose(contrast, (1, 0)).astype(compute_dtype)   # (D, N)
    lab_row = anchor_labels.reshape(-1, 1)                               # (n_pad, 1)
    lab_col = contrast_labels.reshape(1, -1)                             # (1, N)

    kernel = functools.partial(
        _supcon_neg_kernel,
        inv_temp=1.0 / float(temperature),
        # fold the -(T/base_T) scale and the final mean over anchors into one constant
        # (torch's loss.view(anchor_count, ...).mean() is just the mean over all anchors)
        row_scale=float(temperature) / float(base_temperature) / n_anchor,
        n_anchor=n_anchor,
        block_rows=tb)

    partials = pl.pallas_call(
        kernel,
        out_shape=jax.ShapeDtypeStruct((num_tiles, 8, 128), jnp.float32),
        grid=(num_tiles,),
        in_specs=[
            pl.BlockSpec((tb, d), lambda i: (i, 0)),            # streamed anchor tiles
            pl.BlockSpec((d, n_contrast), lambda i: (0, 0)),     # resident contrast slab
            pl.BlockSpec((tb, 1), lambda i: (i, 0)),             # anchor labels (per tile)
            pl.BlockSpec((1, n_contrast), lambda i: (0, 0)),     # resident contrast labels
        ],
        out_specs=pl.BlockSpec((1, 8, 128), lambda i: (i, 0, 0)),
        compiler_params=pltpu.CompilerParams(
            dimension_semantics=("parallel",)),
    )(anchor, contrast_t, lab_row, lab_col)

    # Reduce the handful of per-tile partials in plain JAX.
    return partials[:, 0, 0].sum()


def _reference(features, labels=None, temperature=1.0, contrast_mode='all',
               base_temperature=0.5):
    """Literal pure-JAX port of the PyTorch SupConNegLoss.forward."""
    feats = features.reshape(features.shape[0], features.shape[1], -1).astype(jnp.float32)
    bsz, n_views, d = feats.shape
    if labels is None:
        base_mask = jnp.eye(bsz, dtype=jnp.float32)
    else:
        lab = labels.reshape(-1, 1)
        base_mask = (lab == lab.T).astype(jnp.float32)
    contrast = jnp.transpose(feats, (1, 0, 2)).reshape(n_views * bsz, d)
    if contrast_mode == 'one':
        anchor, anchor_count = feats[:, 0], 1
    else:
        anchor, anchor_count = contrast, n_views
    logits = (anchor @ contrast.T) / temperature
    m = jnp.tile(base_mask, (anchor_count, n_views))
    n_a = anchor.shape[0]
    logits_mask = jnp.zeros_like(m).at[jnp.arange(n_a), jnp.arange(n_a)].set(1.0)
    m = (1.0 - m) + logits_mask
    exp_logits = jnp.exp(logits) * m
    log_prob = logits - jnp.log(exp_logits.sum(1, keepdims=True))
    mean_log_prob_pos = (logits_mask * log_prob).sum(1) / logits_mask.sum(1)
    loss = -(temperature / base_temperature) * mean_log_prob_pos
    return loss.mean()


if __name__ == "__main__":
    key = jax.random.PRNGKey(0)
    k1, k2 = jax.random.split(key)

    bsz, n_views, d = 8, 2, 32
    num_classes = 3

    feats = jax.random.normal(k1, (bsz, n_views, d), dtype=jnp.float32)
    feats = feats / jnp.linalg.norm(feats, axis=-1, keepdims=True)  # SupCon embeddings are L2-normalized
    labels = jax.random.randint(k2, (bsz,), 0, num_classes, dtype=jnp.int32)

    # f32 compute path; small row tile so the grid really has several steps.
    loss_f32 = supcon_neg_loss(feats, labels, temperature=1.0, base_temperature=0.5,
                               compute_dtype=jnp.float32, block_rows=8)
    jax.block_until_ready(loss_f32)
    ref = _reference(feats, labels, temperature=1.0, base_temperature=0.5)
    assert bool(jnp.isfinite(loss_f32)), loss_f32
    assert jnp.allclose(loss_f32, ref, rtol=1e-2, atol=1e-2), (loss_f32, ref)

    # bf16 matmul operands (production path), looser tolerance vs. the f32 reference.
    loss_bf16 = supcon_neg_loss(feats, labels, temperature=1.0, base_temperature=0.5,
                                compute_dtype=jnp.bfloat16, block_rows=8)
    jax.block_until_ready(loss_bf16)
    assert jnp.allclose(loss_bf16, ref, rtol=5e-2, atol=5e-2), (loss_bf16, ref)

    # contrast_mode='one' and the unsupervised (labels=None / SimCLR) path.
    loss_one = supcon_neg_loss(feats, labels, contrast_mode='one',
                               compute_dtype=jnp.float32, block_rows=8)
    ref_one = _reference(feats, labels, contrast_mode='one')
    assert jnp.allclose(loss_one, ref_one, rtol=1e-2, atol=1e-2), (loss_one, ref_one)

    loss_simclr = supcon_neg_loss(feats, None, compute_dtype=jnp.float32, block_rows=8)
    ref_simclr = _reference(feats, None)
    assert jnp.allclose(loss_simclr, ref_simclr, rtol=1e-2, atol=1e-2), (loss_simclr, ref_simclr)

    print("KERNEL_OK")
</pallas_src>

<mosaic_0001>
module attributes {stable_mosaic.version = 11 : i64} {
  func.func @_supcon_neg_kernel(%arg0: i32, %arg1: memref<8x32xf32, #tpu.memory_space<vmem>>, %arg2: memref<32x16xf32, #tpu.memory_space<vmem>>, %arg3: memref<8x1xi32, #tpu.memory_space<vmem>>, %arg4: memref<1x16xi32, #tpu.memory_space<vmem>>, %arg5: memref<1x8x128xf32, #tpu.memory_space<vmem>>) attributes {dimension_semantics = [#tpu.dimension_semantics<parallel>], iteration_bounds = array<i64: 2>, scalar_prefetch = 0 : i64, scratch_operands = 0 : i64, tpu.core_type = #tpu.core_type<tc>, window_params = [{transform_indices = @transform_0, window_bounds = array<i64: 8, 32>}, {pipeline_mode = #tpu.pipeline_mode<synchronous>, transform_indices = @transform_1, window_bounds = array<i64: 32, 16>}, {transform_indices = @transform_2, window_bounds = array<i64: 8, 1>}, {pipeline_mode = #tpu.pipeline_mode<synchronous>, transform_indices = @transform_3, window_bounds = array<i64: 1, 16>}, {transform_indices = @transform_4, window_bounds = array<i64: 1, 8, 128>}]} {
    %c8_i32 = arith.constant 8 : i32
    %0 = arith.muli %arg0, %c8_i32 : i32
    %c0 = arith.constant 0 : index
    %c0_0 = arith.constant 0 : index
    %1 = vector.load %arg1[%c0, %c0_0] : memref<8x32xf32, #tpu.memory_space<vmem>>, vector<8x32xf32>
    %c0_1 = arith.constant 0 : index
    %c0_2 = arith.constant 0 : index
    %2 = vector.load %arg2[%c0_1, %c0_2] : memref<32x16xf32, #tpu.memory_space<vmem>>, vector<32x16xf32>
    %cst = arith.constant dense<0.000000e+00> : vector<8x16xf32>
    %3 = tpu.matmul %1, %2, %cst {dimension_numbers = #tpu.dot_dimension_numbers<[1], [0], [0], [1], [0, 0, 1, 1], [], []>} : vector<8x32xf32>, vector<32x16xf32>, vector<8x16xf32> -> vector<8x16xf32>
    %cst_3 = arith.constant 1.000000e+00 : f32
    %4 = vector.broadcast %cst_3 : f32 to vector<8x16xf32>
    %5 = arith.mulf %3, %4 : vector<8x16xf32>
    %6 = tpu.iota {dimensions = array<i32: 0>} : vector<8x1xi32>
    %7 = vector.broadcast %0 : i32 to vector<8x1xi32>
    %8 = arith.addi %7, %6 : vector<8x1xi32>
    %9 = tpu.iota {dimensions = array<i32: 1>} : vector<8x16xi32>
    %10 = vector.broadcast %8 : vector<8x1xi32> to vector<8x16xi32>
    %11 = arith.cmpi eq, %9, %10 : vector<8x16xi32>
    %c0_4 = arith.constant 0 : index
    %c0_5 = arith.constant 0 : index
    %12 = vector.load %arg3[%c0_4, %c0_5] : memref<8x1xi32, #tpu.memory_space<vmem>>, vector<8x1xi32>
    %c0_6 = arith.constant 0 : index
    %c0_7 = arith.constant 0 : index
    %13 = vector.load %arg4[%c0_6, %c0_7] : memref<1x16xi32, #tpu.memory_space<vmem>>, vector<1x16xi32>
    %14 = vector.broadcast %12 : vector<8x1xi32> to vector<8x16xi32>
    %15 = vector.broadcast %13 : vector<1x16xi32> to vector<8x16xi32>
    %16 = arith.cmpi ne, %14, %15 : vector<8x16xi32>
    %17 = arith.ori %16, %11 : vector<8x16xi1>
    %cst_8 = arith.constant -1.000000e+30 : f32
    %18 = vector.broadcast %cst_8 : f32 to vector<8x16xf32>
    %19 = arith.select %17, %5, %18 : vector<8x16xi1>, vector<8x16xf32>
    %cst_9 = arith.constant dense<0xFF800000> : vector<8xf32>
    %20 = vector.multi_reduction <maximumf>, %19, %cst_9 [1] : vector<8x16xf32> to vector<8xf32>
    %21 = vector.shape_cast %20 : vector<8xf32> to vector<8x1xf32>
    %22 = vector.broadcast %21 : vector<8x1xf32> to vector<8x16xf32>
    %23 = arith.subf %19, %22 : vector<8x16xf32>
    %24 = math.exp %23 : vector<8x16xf32>
    %cst_10 = arith.constant dense<0.000000e+00> : vector<8xf32>
    %25 = vector.multi_reduction <add>, %24, %cst_10 [1] : vector<8x16xf32> to vector<8xf32>
    %26 = vector.shape_cast %25 : vector<8xf32> to vector<8x1xf32>
    %27 = math.log %26 : vector<8x1xf32>
    %28 = arith.addf %21, %27 : vector<8x1xf32>
    %cst_11 = arith.constant 0.000000e+00 : f32
    %29 = vector.broadcast %cst_11 : f32 to vector<8x16xf32>
    %30 = arith.select %11, %5, %29 : vector<8x16xi1>, vector<8x16xf32>
    %cst_12 = arith.constant dense<0.000000e+00> : vector<8xf32>
    %31 = vector.multi_reduction <add>, %30, %cst_12 [1] : vector<8x16xf32> to vector<8xf32>
    %32 = vector.shape_cast %31 : vector<8xf32> to vector<8x1xf32>
    %33 = arith.subf %28, %32 : vector<8x1xf32>
    %c16_i32 = arith.constant 16 : i32
    %34 = vector.broadcast %c16_i32 : i32 to vector<8x1xi32>
    %35 = arith.cmpi slt, %8, %34 : vector<8x1xi32>
    %cst_13 = arith.constant 0.000000e+00 : f32
    %36 = vector.broadcast %cst_13 : f32 to vector<8x1xf32>
    %37 = arith.select %35, %33, %36 : vector<8x1xi1>, vector<8x1xf32>
    %38 = vector.shape_cast %37 : vector<8x1xf32> to vector<1x8x1xf32>
    %cst_14 = arith.constant dense<0.000000e+00> : vector<1xf32>
    %39 = vector.multi_reduction <add>, %38, %cst_14 [1, 2] : vector<1x8x1xf32> to vector<1xf32>
    %40 = vector.shape_cast %39 : vector<1xf32> to vector<1x1x1xf32>
    %41 = vector.extract %40[0, 0, 0] : f32 from vector<1x1x1xf32>
    %cst_15 = arith.constant 1.250000e-01 : f32
    %42 = arith.mulf %41, %cst_15 : f32
    %43 = vector.broadcast %42 : f32 to vector<1x8x128xf32>
    %c0_16 = arith.constant 0 : index
    %c0_17 = arith.constant 0 : index
    %c0_18 = arith.constant 0 : index
    %44 = vector.load %arg5[%c0_16, %c0_17, %c0_18] : memref<1x8x128xf32, #tpu.memory_space<vmem>>, vector<1x8x128xf32>
    tpu.vector_store %arg5[%c0_16, %c0_17, %c0_18], %43 {strides = array<i32>} : memref<1x8x128xf32, #tpu.memory_space<vmem>>, vector<1x8x128xf32>,
    return
  }
  func.func @transform_0(%arg0: i32) -> (i32, i32) {
    %c0_i32 = arith.constant 0 : i32
    %c0_i32_0 = arith.constant 0 : i32
    return %arg0, %c0_i32 : i32, i32
  }
  func.func @transform_1(%arg0: i32) -> (i32, i32) {
    %c0_i32 = arith.constant 0 : i32
    %c0_i32_0 = arith.constant 0 : i32
    %c0_i32_1 = arith.constant 0 : i32
    return %c0_i32, %c0_i32_0 : i32, i32
  }
  func.func @transform_2(%arg0: i32) -> (i32, i32) {
    %c0_i32 = arith.constant 0 : i32
    %c0_i32_0 = arith.constant 0 : i32
    return %arg0, %c0_i32 : i32, i32
  }
  func.func @transform_3(%arg0: i32) -> (i32, i32) {
    %c0_i32 = arith.constant 0 : i32
    %c0_i32_0 = arith.constant 0 : i32
    %c0_i32_1 = arith.constant 0 : i32
    return %c0_i32, %c0_i32_0 : i32, i32
  }
  func.func @transform_4(%arg0: i32) -> (i32, i32, i32) {
    %c0_i32 = arith.constant 0 : i32
    %c0_i32_0 = arith.constant 0 : i32
    %c0_i32_1 = arith.constant 0 : i32
    return %arg0, %c0_i32, %c0_i32_0 : i32, i32, i32
  }
}

</mosaic_0001>

<bundles_post_ra>
// kernel: tpu_custom_call.1
= control target key start
LH: loop header
LB: loop body
LE: loop exit
PB: predicated region body
PF: predicated region fallthrough
CT: control target
= control target key end

     0   :  { %9 = vsyncpa [#allocation3], 0  ;;  %s729_s0 = inlined_call_operand.vmem [shape: f32[16,32], index: 0, kind: input, shape index: {}]   ;;  %s730_s1 = inlined_call_operand.vmem [shape: f32[32,16], index: 1, kind: input, shape index: {}]   ;;  %s731_s2 = inlined_call_operand.vmem [shape: s32[16,1], index: 2, kind: input, shape index: {}]   ;;  %s732_s3 = inlined_call_operand.vmem [shape: s32[1,16], index: 3, kind: input, shape index: {}]   ;;  %s733_s4 = inlined_call_operand.hbm [shape: f32[2,8,128], index: 4, kind: output, shape index: {}]  }
   0x1   :  { %11 = vsyncpa [#allocation3 + $0x1], 0  ;;  %s608_s15 = smov 0   ;;  %s610_s16 = smov 0  }
   0x2   :  { %s612_s17 = smov 0   ;;  %s614_s18 = smov 0  }
   0x3 LB: > { %s629_s19 = sadd.s32 4294967295, %s576_s18   ;;  %s428_s20 = sadd.s32 4294967294, %s576_s18   ;;  %s576_s18 = sphi %s614_s18, %s739_s18   ;;  %s572_s17 = sphi %s612_s17, %s738_s17   ;;  %s568_s16 = sphi %s610_s16, %s737_s16   ;;  %s564_s15 = sphi %s608_s15, %s736_s15  }
   0x4   : > { %s633_s21 = sadd.s32 1, %s576_s18   ;;  %s118_s22 = sadd.s32 1, %s572_s17 }
   0x5   : > { %s115_s23 = ssub.s32 %s576_s18, %s633_s21  ;;  %p128_p0 = scmp.ne.s32.totalorder %s572_s17, %s568_s16 }
   0x6   : > { %p116_p1 = scmp.eq.s32.totalorder %s115_s23, 0  ;;  %p129_p2 = scmp.eq.s32.totalorder %s629_s19, 1 }
   0x7   : > { %p134_p3 = scmp.ne.s32.totalorder %s568_s16, %s564_s15  ;;  %p135_p4 = scmp.eq.s32.totalorder %s428_s20, 1 }
   0x8   : > { %s644_s24 = scalar_select %p116_p1, %s572_s17, %s118_s22  }
   0x9   : > { %p646_p5 = por %p129_p2, %p128_p0  ;;  %p650_p6 = por %p135_p4, %p134_p3 }
   0xa   : > { %p431_p7 = scmp.ge.s32.totalorder %s576_s18, 1  ;;  %p173_p8 = scmp.lt.s32.totalorder %s576_s18, 3 }
   0xc   : > { %p174_p9 = pnand %p431_p7, %p173_p8 }
   0xd   : > { %v212_v0 = vld [vmem:[%s730_s1] sm:$0xff] (!%p174_p9)  ;;  %v213_v1 = vld [vmem:[%s730_s1 + $0x8] sm:$0xff] (!%p174_p9)  ;;  %v214_v2 = vld [vmem:[%s730_s1 + $0x10] sm:$0xff] (!%p174_p9)  ;;  %v578_v3 = vmov (!%p174_p9), 0.0|0.0   ;;  %vm579_vm0 = vmmov (!%p174_p9), 0   ;;  %v580_v6 = vmov (!%p174_p9), 0.0   ;;  %v290_v11 = vlaneseq (!%p174_p9) }
   0xe   : > { %177 = sbr.rel (%p174_p9) target bundleno = 780 (0x30c), region = 36  ;;  %458 = vmatprep.subr.bf16.mxu0 (!%p174_p9), %v578_v3  ;;  %v459_v4 = vpack.c.bf16 (!%p174_p9), %v213_v1, %v212_v0  ;;  %v215_v5 = vld [vmem:[%s730_s1 + $0x18] sm:$0xff] (!%p174_p9)  ;;  %455 = vmatprep.mubr.msk.f32.mxu0 (!%p174_p9), %vm579_vm0, %v580_v6  ;;  %p202_p10 = scmp.lt.s32.totalorder (!%p174_p9), %s629_s19, 1  ;;  %v581_v7 = vmov (!%p174_p9), 0   ;;  %vm216_vm1 = vcmask (!%p174_p9), 261120   ;;  %vm309_vm5 = vcmask (!%p174_p9), 130048  }
   0xf   : > { %509 = vset.pattern.permute.xlu0 (!%p174_p9), %v581_v7  ;;  %v462_v8 = vpack.c.bf16 (!%p174_p9), %v215_v5, %v214_v2  ;;  %s435_s23 = sshll.u32 (!%p174_p9), %s629_s19, 3  ;;  %v291_v12 = vshrl.u32 (!%p174_p9), %v290_v11, 7  ;;  %v295_v15 = vand.u32 (!%p174_p9), 127, %v290_v11  ;;  %v437_v16 = vld [vmem:[%s732_s3] ss:$0 sm:$0xff] (!%p174_p9)  ;;  %vm329_vm7 = vcmask (!%p174_p9), 7168  }
  0x10   : > { %460 = vmatpush3.bf16.msra.mxu0 (!%p174_p9), %v459_v4  ;;  %v292_v13 = vstv (!%p174_p9), %s435_s23  ;;  %s199_s29 = sand.u32 (!%p174_p9), 1, %s568_s16   ;;  %s439_s7 = sshll.u32 (!%p174_p9), %s629_s19, 7 }
  0x11   : > { %461 = vmatprep.subr.bf16.mxu0 (!%p174_p9), %v578_v3  ;;  %v293_v14 = vadd.s32 (!%p174_p9), %v292_v13, %v291_v12  ;;  %s432_s30 = sshll.u32 (!%p174_p9), %s199_s29, 3  ;;  %s687_s12 = scalar_lea.hbm (!%p174_p9), %s733_s4, %s439_s7 }
  0x12   : > { %s201_s5 = scalar_lea.vmem (!%p174_p9), [#allocation2], %s432_s30 }
  0x13   : > { %vm296_vm2 = vcmp.eq.s32.totalorder (!%p174_p9), %v295_v15, %v293_v14  ;;  %vm327_vm6 = vcmp.lt.s32.totalorder (!%p174_p9), %v293_v14, 16  ;;  %s357_s6 = sshll.u32 (!%p174_p9), %s201_s5, 4  ;;  %s689_s6 = int_to_ptr.vmem [resolvable:$true] %s357_s6 }
  0x14   : > { %463 = vmatpush3.bf16.msra.mxu0 (!%p174_p9), %v462_v8  ;;  %s514_s14 = scalar_lea.vmem (!%p174_p9), %s689_s6, 128 }
  0x15   : > { %s203_s9 = scalar_select %p202_p10, %s629_s19, 1 }
  0x16   : > { %p515_p11 = scmp.ne.s32.totalorder %s689_s6, %s514_s14  ;;  %s582_s19 = smov [#allocation2]  }
  0x17   : > { %s433_s10 = sshll.u32 %s203_s9, 3  ;;  %s518_s20 = sshll.u32 %s582_s19, 4  ;;  %s519_s20 = int_to_ptr.vmem [resolvable:$false] %s518_s20 }
  0x18   : > { %s205_s13 = scalar_lea.vmem %s729_s0, %s433_s10  ;;  %s209_s22 = scalar_lea.vmem %s731_s2, %s433_s10 }
  0x19   : > { %v211_v9 = vld [vmem:[%s205_s13] sm:$0xff]  ;;  %s344_s13 = scalar_lea.sflag [#allocation3], %s199_s29  ;;  %p516_p12 = pnand %p515_p11, %p646_p5 }
  0x1a   : > { %v297_v10 = vld [vmem:[%s209_s22] sm:$0xff]  ;;  %456 = vmatmul.mubr.msk.f32.vlgmr.msra.gmra.mrb[0].mxu0 %vm216_vm1, %v211_v9  ;;  %s520_s22 = scalar_lea.vmem %s519_s20, 256  ;;  %p521_p0 = scmp.lt.s32.totalorder %s689_s6, %s519_s20 }
  0x1b   : > { %300 = vperm.xlu0 %509, %v297_v10   ;;  %p517_p13 = pneg %p516_p12  ;;  %p522_p1 = scmp.lt.s32.totalorder %s520_s22, %s514_s14 }
  0x1d   : > { %p523_p2 = por %p522_p1, %p521_p0 }
  0x1f   : > { %p524_p3 = pnand %p523_p2, %p517_p13 }
  0x9a   : > { %v301_v17 = vpop.permute.xlu0 %300 }
  0x9b   : > { %vm306_vm3 = vcmp.ne.s32.totalorder %v301_v17, %v437_v16 }
  0x9c   : > { %vm307_vm4 = vmor %vm306_vm3, %vm296_vm2 }
  0xed   : > { %v286_v18 = vpop.f32.mrb[0].mxu0 }
  0xee   : > { %v457_v19 = vpop.f32.mrb[1].mxu0  ;;  %v308_v20 = vsel %vm307_vm4, %v286_v18, -1e+30  ;;  %v322_v27 = vsel %vm296_vm2, %v286_v18, 0.0 }
  0xef   : > { %v310_v21 = vsel %vm309_vm5, %v308_v20, -inf  ;;  %v323_v28 = vsel %vm309_vm5, %v322_v27, 0.0 }
  0xf0   : > { %311 = vmax.xlane.f32.xlu0 %v310_v21 }
 0x17d   : > { %v312_v22 = vpop.xlane.xlu0 %311 }
 0x17e   : > { %v313_v23 = vsub.f32 %v308_v20, %v312_v22 }
 0x180   : > { %v314_v24 = vmul.f32 1.442695, %v313_v23 }
 0x182   : > { %510 = vpow2.f32 %v314_v24 }
 0x18c   : > { %v511_v25 = vpop.eup %510 }
 0x18d   : > { %v316_v26 = vsel %vm309_vm5, %v511_v25, 0.0 }
 0x18e   : > { %317 = vadd.xlane.f32.xlu1 %v316_v26 }
 0x192   : > { %324 = vadd.xlane.f32.xlu1 %v323_v28 }
 0x21b   : > { %v318_v29 = vpop.xlane.xlu1 %317 }
 0x21c   : > { %512 = vlog2.f32 %v318_v29 }
 0x21f   : > { %v325_v33 = vpop.xlane.xlu1 %324 }
 0x226   : > { %v513_v30 = vpop.eup %512 }
 0x227   : > { %v320_v31 = vmul.f32 0.6931472, %v513_v30 }
 0x229   : > { %v321_v32 = vadd.f32 %v320_v31, %v312_v22 }
 0x22b   : > { %v326_v34 = vsub.f32 %v321_v32, %v325_v33 }
 0x22d   : > { %v328_v35 = vsel %vm327_vm6, %v326_v34, 0.0 }
 0x22e   : > { %v330_v36 = vsel %vm329_vm7, %v328_v35, 0.0 }
 0x22f   : > { %331 = vadd.xlane.f32.xlu1 %v330_v36 }
 0x2bc   : > { %v332_v37 = vpop.xlane.xlu1 %331 }
 0x2bd   : > { %v333_v38 = vrot.slane %v332_v37, 4 }
 0x2bf   : > { %v334_v39 = vadd.f32 %v333_v38, %v332_v37 }
 0x2c1   : > { %v335_v40 = vrot.slane %v334_v39, 2 }
 0x2c3   : > { %v336_v41 = vadd.f32 %v335_v40, %v334_v39 }
 0x2c5   : > { %v337_v42 = vrot.slane %v336_v41, 1 }
 0x2c7   : > { %v338_v43 = vadd.f32 %v337_v42, %v336_v41 }
 0x2c9   : > { %464 = vpush %v338_v43 }
 0x2fa   : > { %s465_s8 = spop %464 }
 0x2fb   : > { %s340_s9 = smul.f32 0.125, %s465_s8 }
 0x2fd   : > { %v341_v44 = vstv %s340_s9 }
 0x2fe   : > { %342 = vst [vmem:[%s201_s5] sm:$0xff] %v341_v44 }
 0x2ff   : > { %527 = shalt.err (!%p524_p3)
}
 0x300   : > { %s528_s23 = scalar_lea.hbm %s687_s12, 128  ;;  %s532_s29 = scalar_lea.hbm %s733_s4, 256 }
 0x301   : > { %p529_p4 = scmp.ne.s32.totalorder %s687_s12, %s528_s23  ;;  %p533_p9 = scmp.lt.u32.totalorder %s687_s12, %s733_s4 }
 0x302   : > { %p534_p10 = scmp.lt.u32.totalorder %s532_s29, %s528_s23  ;;  %p536_p12 = scmp.lt.u32.totalorder %s528_s23, %s687_s12 }
 0x303   : > { %p530_p7 = pnand %p529_p4, %p646_p5 }
 0x304   : > { %p535_p11 = por %p534_p10, %p533_p9 }
 0x305   : > { %p531_p8 = pneg %p530_p7 }
 0x306   : > { %p537_p13 = por %p536_p12, %p535_p11 }
 0x308   : > { %p538_p0 = pnand %p537_p13, %p531_p8 }
 0x30a   : > { %541 = shalt.err (!%p538_p0)
}
 0x30b   : > { %466 = dma.vmem_to_hbm [thread:$0]  (%p646_p5), %s689_s6, 128, %s687_s12, %s344_s13  }
 0x30c PF: > { %p472_p1 = scmp.ge.s32.totalorder %s576_s18, 2  ;;  %s369_s7 = sand.u32 1, %s564_s15  }
 0x30d   : > { %s370_s8 = scalar_lea.sflag [#allocation3], %s369_s7 }
 0x30e   : > { %p469_p2 = pnand %p472_p1, %p650_p6 }
 0x310   : > { %559 = dma.done.wait (!%p469_p2), %s370_s8, 128  }
 0x311   : > { %561 = vsyncadd (!%p469_p2), %s370_s8, 4294967168  ;;  %p14_p3 = scmp.ge.s32.totalorder %s633_s21, 4   ;;  %s736_s15 = smov %s568_s16 }
 0x312   : > { %s737_s16 = smov %s572_s17  ;;  %s738_s17 = smov %s644_s24 }
 0x313   : > { %s739_s18 = smov %s633_s21  ;;  %16 = sbr.rel (!%p14_p3) target bundleno = 3 (0x3), region = 74 }
 0x31a   :  { %375 = vsyncpa [#allocation3], 1 }
 0x31b   :  { %377 = vsyncpa [#allocation3 + $0x1], 1 }

</bundles_post_ra>
